<compile_context>
chip_gen: v6e
topology: v6e:2x2x1
jax: 0.10.0
libtpu: 0.0.40
codegen_flags: <defaults>
</compile_context>

<pallas_src>
import functools

import jax
import jax.numpy as jnp
from jax import lax
from jax.experimental import pallas as pl
from jax.experimental.pallas import tpu as pltpu


def _round_up(n, m):
    return -(-n // m) * m


def _choose_tile_rows(n_rows, row_bytes, target_bytes=2 << 20):
    """Row tile (multiple of 8): ~target_bytes per block using the *physical*
    (lane-padded/packed) row width, capped so the grid keeps >= 2 steps when
    possible (v7x has 2 TensorCores)."""
    t = max(8, (target_bytes // row_bytes) // 8 * 8)
    if n_rows >= 16:
        t = min(t, max(8, (n_rows // 2) // 8 * 8))
    return min(t, n_rows)


# ---------------------------------------------------------------------------
# Kernels
# ---------------------------------------------------------------------------

def _fused_ln_kernel_packed(x_ref, y_ref, q_ref, g_ref, b_ref, seg_ref, o_ref,
                            *, eps, hidden):
    """Lane-dense path: 128 // hidden logical rows packed per 128-lane row.

    Per-logical-row sums are computed as z @ seg where seg is a (128,128)
    block-diagonal ones matrix; the MXU result is already broadcast across
    each segment's lanes.
    """
    z = ((x_ref[...].astype(jnp.float32) + y_ref[...].astype(jnp.float32)) * 0.5
         + q_ref[...].astype(jnp.float32))
    seg = seg_ref[...]
    inv_h = 1.0 / float(hidden)

    # Two-pass LayerNorm (matches the framework reference numerically).
    s1 = jnp.dot(z, seg, preferred_element_type=jnp.float32,
                 precision=lax.Precision.HIGHEST)
    mean = s1 * inv_h
    d = z - mean
    s2 = jnp.dot(d * d, seg, preferred_element_type=jnp.float32,
                 precision=lax.Precision.HIGHEST)
    var = s2 * inv_h
    normed = d * lax.rsqrt(var + eps)

    # Dropout: eval mode -> identity.
    o_ref[...] = (normed * g_ref[...] + b_ref[...]).astype(o_ref.dtype)


def _fused_ln_kernel_rowwise(x_ref, y_ref, q_ref, g_ref, b_ref, o_ref,
                             *, eps, hidden, hidden_padded):
    """General path (H >= 128 or 128 % H != 0): one logical row per lane-row,
    hidden padded to a multiple of 128 so the output store is unmasked."""
    z = ((x_ref[...].astype(jnp.float32) + y_ref[...].astype(jnp.float32)) * 0.5
         + q_ref[...].astype(jnp.float32))
    inv_h = 1.0 / float(hidden)

    s1 = jnp.sum(z, axis=-1, keepdims=True)          # padded lanes are zero
    mean = s1 * inv_h
    d = z - mean
    if hidden != hidden_padded:
        lane = lax.broadcasted_iota(jnp.int32, (1, hidden_padded), 1)
        d = jnp.where(lane < hidden, d, 0.0)         # mask pad out of variance
    s2 = jnp.sum(d * d, axis=-1, keepdims=True)
    var = s2 * inv_h
    normed = d * lax.rsqrt(var + eps)

    o_ref[...] = (normed * g_ref[...] + b_ref[...]).astype(o_ref.dtype)


# ---------------------------------------------------------------------------
# Wrapper
# ---------------------------------------------------------------------------

def add_module_forward(x, y, q, gamma, beta, *, eps=1e-5):
    """out = LayerNorm((x + y) * 0.5 + q) * gamma + beta (dropout in eval mode).

    x, y, q: (B, S, H); gamma, beta: (H,). Operates on the flattened row-major
    (B*S, H) slab, repacked lane-dense as (B*S*H/128, 128) when H divides 128.
    """
    B, S, H = x.shape
    rows = B * S
    out_dtype = x.dtype

    vmem_limit = 32 * 1024 * 1024     # < v7x 64 MiB physical, > v5e scoped default
    target_block_bytes = 2 << 20      # 1-4 MiB blocks sit at the HBM-roofline plateau

    lane_dense = (H < 128) and (128 % H == 0)

    if lane_dense:
        pack = 128 // H               # logical rows per physical 128-lane row
        width = 128
        n_packed = _round_up(_round_up(rows, pack) // pack, 8)
        tile = _choose_tile_rows(n_packed, width * 4, target_block_bytes)
        n_packed = _round_up(n_packed, tile)
        rows_padded = n_packed * pack

        def prep(a):
            a2 = a.reshape(rows, H)
            if rows_padded != rows:
                a2 = jnp.pad(a2, ((0, rows_padded - rows), (0, 0)))
            return a2.reshape(n_packed, width)

        x2, y2, q2 = prep(x), prep(y), prep(q)
        g2 = jnp.tile(gamma.astype(jnp.float32).reshape(1, H), (1, pack))
        b2 = jnp.tile(beta.astype(jnp.float32).reshape(1, H), (1, pack))
        lane = jnp.arange(width)
        seg = (lane[:, None] // H == lane[None, :] // H).astype(jnp.float32)

        row_spec = pl.BlockSpec((tile, width), lambda i: (i, 0))
        vec_spec = pl.BlockSpec((1, width), lambda i: (0, 0))
        seg_spec = pl.BlockSpec((width, width), lambda i: (0, 0))

        out = pl.pallas_call(
            functools.partial(_fused_ln_kernel_packed, eps=eps, hidden=H),
            out_shape=jax.ShapeDtypeStruct((n_packed, width), out_dtype),
            grid_spec=pl.GridSpec(
                grid=(n_packed // tile,),
                in_specs=[row_spec, row_spec, row_spec,
                          vec_spec, vec_spec, seg_spec],
                out_specs=row_spec,
            ),
            compiler_params=pltpu.CompilerParams(
                dimension_semantics=("parallel",),
                vmem_limit_bytes=vmem_limit,
            ),
        )(x2, y2, q2, g2, b2, seg)

        return out.reshape(rows_padded, H)[:rows].reshape(B, S, H)

    # General path: pad hidden to a multiple of 128 so stores are unmasked.
    Hp = _round_up(H, 128)
    n_rows = _round_up(rows, 8)
    tile = _choose_tile_rows(n_rows, Hp * 4, target_block_bytes)
    n_rows = _round_up(n_rows, tile)

    def prep(a):
        a2 = a.reshape(rows, H)
        if n_rows != rows or Hp != H:
            a2 = jnp.pad(a2, ((0, n_rows - rows), (0, Hp - H)))
        return a2

    x2, y2, q2 = prep(x), prep(y), prep(q)
    g2 = jnp.pad(gamma.astype(jnp.float32).reshape(1, H), ((0, 0), (0, Hp - H)))
    b2 = jnp.pad(beta.astype(jnp.float32).reshape(1, H), ((0, 0), (0, Hp - H)))

    row_spec = pl.BlockSpec((tile, Hp), lambda i: (i, 0))
    vec_spec = pl.BlockSpec((1, Hp), lambda i: (0, 0))

    out = pl.pallas_call(
        functools.partial(_fused_ln_kernel_rowwise, eps=eps,
                          hidden=H, hidden_padded=Hp),
        out_shape=jax.ShapeDtypeStruct((n_rows, Hp), out_dtype),
        grid_spec=pl.GridSpec(
            grid=(n_rows // tile,),
            in_specs=[row_spec, row_spec, row_spec, vec_spec, vec_spec],
            out_specs=row_spec,
        ),
        compiler_params=pltpu.CompilerParams(
            dimension_semantics=("parallel",),
            vmem_limit_bytes=vmem_limit,
        ),
    )(x2, y2, q2, g2, b2)

    return out[:rows, :H].reshape(B, S, H)


if __name__ == "__main__":
    B, S, H = 2, 8, 32  # batch, seq, hidden_size

    key = jax.random.PRNGKey(0)
    kx, ky, kq = jax.random.split(key, 3)
    x = jax.random.normal(kx, (B, S, H), dtype=jnp.float32)
    y = jax.random.normal(ky, (B, S, H), dtype=jnp.float32)
    q = jax.random.normal(kq, (B, S, H), dtype=jnp.float32)

    # nn.LayerNorm(hidden_size) default init: weight=1, bias=0
    gamma = jnp.ones((H,), dtype=jnp.float32)
    beta = jnp.zeros((H,), dtype=jnp.float32)

    out = add_module_forward(x, y, q, gamma, beta)
    out = jax.block_until_ready(out)

    # Pure-JAX reference (eval-mode dropout == identity, additive fusion_net).
    z = (x + y) * 0.5 + q
    mean = jnp.mean(z, axis=-1, keepdims=True)
    var = jnp.mean((z - mean) ** 2, axis=-1, keepdims=True)
    ref = (z - mean) * jax.lax.rsqrt(var + 1e-5) * gamma + beta
    assert jnp.allclose(out, ref, atol=1e-4, rtol=1e-4), (
        float(jnp.max(jnp.abs(out - ref))))

    print("KERNEL_OK")
</pallas_src>

<mosaic_0001>
module attributes {stable_mosaic.version = 11 : i64} {
  func.func @_fused_ln_kernel_packed(%arg0: i32, %arg1: memref<8x128xf32, #tpu.memory_space<vmem>>, %arg2: memref<8x128xf32, #tpu.memory_space<vmem>>, %arg3: memref<8x128xf32, #tpu.memory_space<vmem>>, %arg4: memref<1x128xf32, #tpu.memory_space<vmem>>, %arg5: memref<1x128xf32, #tpu.memory_space<vmem>>, %arg6: memref<128x128xf32, #tpu.memory_space<vmem>>, %arg7: memref<8x128xf32, #tpu.memory_space<vmem>>) attributes {dimension_semantics = [#tpu.dimension_semantics<parallel>], iteration_bounds = array<i64: 1>, scalar_prefetch = 0 : i64, scratch_operands = 0 : i64, tpu.core_type = #tpu.core_type<tc>, window_params = [{transform_indices = @transform_0, window_bounds = array<i64: 8, 128>}, {transform_indices = @transform_1, window_bounds = array<i64: 8, 128>}, {transform_indices = @transform_2, window_bounds = array<i64: 8, 128>}, {pipeline_mode = #tpu.pipeline_mode<synchronous>, transform_indices = @transform_3, window_bounds = array<i64: 1, 128>}, {pipeline_mode = #tpu.pipeline_mode<synchronous>, transform_indices = @transform_4, window_bounds = array<i64: 1, 128>}, {pipeline_mode = #tpu.pipeline_mode<synchronous>, transform_indices = @transform_5, window_bounds = array<i64: 128, 128>}, {transform_indices = @transform_6, window_bounds = array<i64: 8, 128>}]} {
    %c0 = arith.constant 0 : index
    %c0_0 = arith.constant 0 : index
    %0 = vector.load %arg1[%c0, %c0_0] : memref<8x128xf32, #tpu.memory_space<vmem>>, vector<8x128xf32>
    %c0_1 = arith.constant 0 : index
    %c0_2 = arith.constant 0 : index
    %1 = vector.load %arg2[%c0_1, %c0_2] : memref<8x128xf32, #tpu.memory_space<vmem>>, vector<8x128xf32>
    %2 = arith.addf %0, %1 : vector<8x128xf32>
    %cst = arith.constant 5.000000e-01 : f32
    %3 = vector.broadcast %cst : f32 to vector<8x128xf32>
    %4 = arith.mulf %2, %3 : vector<8x128xf32>
    %c0_3 = arith.constant 0 : index
    %c0_4 = arith.constant 0 : index
    %5 = vector.load %arg3[%c0_3, %c0_4] : memref<8x128xf32, #tpu.memory_space<vmem>>, vector<8x128xf32>
    %6 = arith.addf %4, %5 : vector<8x128xf32>
    %c0_5 = arith.constant 0 : index
    %c0_6 = arith.constant 0 : index
    %7 = vector.load %arg6[%c0_5, %c0_6] : memref<128x128xf32, #tpu.memory_space<vmem>>, vector<128x128xf32>
    %cst_7 = arith.constant dense<0.000000e+00> : vector<8x128xf32>
    %8 = tpu.matmul %6, %7, %cst_7 {dimension_numbers = #tpu.dot_dimension_numbers<[1], [0], [0], [1], [0, 0, 1, 1], [], []>, precision = #tpu.contract_precision<fp32>} : vector<8x128xf32>, vector<128x128xf32>, vector<8x128xf32> -> vector<8x128xf32>
    %cst_8 = arith.constant 3.125000e-02 : f32
    %9 = vector.broadcast %cst_8 : f32 to vector<8x128xf32>
    %10 = arith.mulf %8, %9 : vector<8x128xf32>
    %11 = arith.subf %6, %10 : vector<8x128xf32>
    %12 = arith.mulf %11, %11 : vector<8x128xf32>
    %cst_9 = arith.constant dense<0.000000e+00> : vector<8x128xf32>
    %13 = tpu.matmul %12, %7, %cst_9 {dimension_numbers = #tpu.dot_dimension_numbers<[1], [0], [0], [1], [0, 0, 1, 1], [], []>, precision = #tpu.contract_precision<fp32>} : vector<8x128xf32>, vector<128x128xf32>, vector<8x128xf32> -> vector<8x128xf32>
    %cst_10 = arith.constant 3.125000e-02 : f32
    %14 = vector.broadcast %cst_10 : f32 to vector<8x128xf32>
    %15 = arith.mulf %13, %14 : vector<8x128xf32>
    %cst_11 = arith.constant 9.99999974E-6 : f32
    %16 = vector.broadcast %cst_11 : f32 to vector<8x128xf32>
    %17 = arith.addf %15, %16 : vector<8x128xf32>
    %18 = math.rsqrt %17 : vector<8x128xf32>
    %19 = arith.mulf %11, %18 : vector<8x128xf32>
    %c0_12 = arith.constant 0 : index
    %c0_13 = arith.constant 0 : index
    %20 = vector.load %arg4[%c0_12, %c0_13] : memref<1x128xf32, #tpu.memory_space<vmem>>, vector<1x128xf32>
    %21 = vector.broadcast %20 : vector<1x128xf32> to vector<8x128xf32>
    %22 = arith.mulf %19, %21 : vector<8x128xf32>
    %c0_14 = arith.constant 0 : index
    %c0_15 = arith.constant 0 : index
    %23 = vector.load %arg5[%c0_14, %c0_15] : memref<1x128xf32, #tpu.memory_space<vmem>>, vector<1x128xf32>
    %24 = vector.broadcast %23 : vector<1x128xf32> to vector<8x128xf32>
    %25 = arith.addf %22, %24 : vector<8x128xf32>
    %c0_16 = arith.constant 0 : index
    %c0_17 = arith.constant 0 : index
    %26 = vector.load %arg7[%c0_16, %c0_17] : memref<8x128xf32, #tpu.memory_space<vmem>>, vector<8x128xf32>
    tpu.vector_store %arg7[%c0_16, %c0_17], %25 {strides = array<i32>} : memref<8x128xf32, #tpu.memory_space<vmem>>, vector<8x128xf32>,
    return
  }
  func.func @transform_0(%arg0: i32) -> (i32, i32) {
    %c0_i32 = arith.constant 0 : i32
    %c0_i32_0 = arith.constant 0 : i32
    return %arg0, %c0_i32 : i32, i32
  }
  func.func @transform_1(%arg0: i32) -> (i32, i32) {
    %c0_i32 = arith.constant 0 : i32
    %c0_i32_0 = arith.constant 0 : i32
    return %arg0, %c0_i32 : i32, i32
  }
  func.func @transform_2(%arg0: i32) -> (i32, i32) {
    %c0_i32 = arith.constant 0 : i32
    %c0_i32_0 = arith.constant 0 : i32
    return %arg0, %c0_i32 : i32, i32
  }
  func.func @transform_3(%arg0: i32) -> (i32, i32) {
    %c0_i32 = arith.constant 0 : i32
    %c0_i32_0 = arith.constant 0 : i32
    %c0_i32_1 = arith.constant 0 : i32
    return %c0_i32, %c0_i32_0 : i32, i32
  }
  func.func @transform_4(%arg0: i32) -> (i32, i32) {
    %c0_i32 = arith.constant 0 : i32
    %c0_i32_0 = arith.constant 0 : i32
    %c0_i32_1 = arith.constant 0 : i32
    return %c0_i32, %c0_i32_0 : i32, i32
  }
  func.func @transform_5(%arg0: i32) -> (i32, i32) {
    %c0_i32 = arith.constant 0 : i32
    %c0_i32_0 = arith.constant 0 : i32
    %c0_i32_1 = arith.constant 0 : i32
    return %c0_i32, %c0_i32_0 : i32, i32
  }
  func.func @transform_6(%arg0: i32) -> (i32, i32) {
    %c0_i32 = arith.constant 0 : i32
    %c0_i32_0 = arith.constant 0 : i32
    return %arg0, %c0_i32 : i32, i32
  }
}

</mosaic_0001>

<bundles_post_ra>
// kernel: tpu_custom_call.1
= control target key start
LH: loop header
LB: loop body
LE: loop exit
PB: predicated region body
PF: predicated region fallthrough
CT: control target
= control target key end

     0   :  { %11 = vsyncpa [#allocation3], 0  ;;  %s2864_s0 = inlined_call_operand.hbm [shape: f32[8,128], index: 0, kind: input, shape index: {}]   ;;  %s2865_s1 = inlined_call_operand.hbm [shape: f32[8,128], index: 1, kind: input, shape index: {}]   ;;  %s2866_s2 = inlined_call_operand.hbm [shape: f32[8,128], index: 2, kind: input, shape index: {}]   ;;  %s2867_s3 = inlined_call_operand.vmem [shape: f32[1,128], index: 3, kind: input, shape index: {}]   ;;  %s2868_s4 = inlined_call_operand.vmem [shape: f32[1,128], index: 4, kind: input, shape index: {}]   ;;  %s2869_s5 = inlined_call_operand.hbm [shape: f32[128,128], index: 5, kind: input, shape index: {}]   ;;  %s2870_s6 = inlined_call_operand.hbm [shape: f32[8,128], index: 6, kind: output, shape index: {}]  }
   0x1   :  { %12 = vsyncpa [#allocation6], 0 }
   0x2   :  { %13 = vsyncpa [#allocation9], 0 }
   0x3   :  { %14 = vsyncpa [#allocation4], 0  ;;  %s2163_s21 = smov [#allocation5]   ;;  %s2164_s23 = smov [#allocation2]  }
   0x4   :  { %s31_s22 = sshll.u32 %s2163_s21, 4  ;;  %s21_s24 = sshll.u32 %s2164_s23, 4  ;;  %s32_s22 = int_to_ptr.vmem [resolvable:$true] %s31_s22  ;;  %s22_s24 = int_to_ptr.vmem [resolvable:$true] %s21_s24 }
   0x5   :  { %s2063_s25 = scalar_lea.vmem %s32_s22, 128  ;;  %p2068_p1 = scmp.lt.s32.totalorder %s32_s22, %s32_s22 }
   0x6   :  { %p2064_p0 = scmp.ne.s32.totalorder %s32_s22, %s2063_s25  ;;  %p2069_p2 = scmp.lt.s32.totalorder %s2063_s25, %s2063_s25 }
   0x8   :  { %p2070_p3 = por %p2069_p2, %p2068_p1 }
   0xa   :  { %p2071_p4 = pnand %p2070_p3, %p2064_p0 }
   0xc   :  { %2074 = shalt.err (!%p2071_p4)
}
   0xd   :  { %34 = dma.hbm_to_vmem [thread:$0]  %s2865_s1, 128, %s32_s22, [#allocation6]  }
   0xe   :  { %s2083_s28 = scalar_lea.vmem %s22_s24, 128  ;;  %p2088_p6 = scmp.lt.s32.totalorder %s22_s24, %s22_s24 }
   0xf   :  { %p2084_p5 = scmp.ne.s32.totalorder %s22_s24, %s2083_s28  ;;  %p2089_p7 = scmp.lt.s32.totalorder %s2083_s28, %s2083_s28 }
  0x11   :  { %p2090_p8 = por %p2089_p7, %p2088_p6 }
  0x13   :  { %p2091_p9 = pnand %p2090_p8, %p2084_p5 }
  0x15   :  { %2094 = shalt.err (!%p2091_p9)
}
  0x16   :  { %24 = dma.hbm_to_vmem [thread:$0]  %s2864_s0, 128, %s22_s24, [#allocation3]  }
  0x17   :  { %s2165_s7 = smov [#allocation7]   ;;  %s2166_s9 = smov [#allocation8]  }
  0x18   :  { %s41_s8 = sshll.u32 %s2165_s7, 4  ;;  %s54_s10 = sshll.u32 %s2166_s9, 4  ;;  %s42_s8 = int_to_ptr.vmem [resolvable:$true] %s41_s8  ;;  %s55_s10 = int_to_ptr.vmem [resolvable:$true] %s54_s10 }
  0x19   :  { %s2103_s11 = scalar_lea.vmem %s42_s8, 128  ;;  %p2108_p11 = scmp.lt.s32.totalorder %s42_s8, %s42_s8 }
  0x1a   :  { %p2104_p10 = scmp.ne.s32.totalorder %s42_s8, %s2103_s11  ;;  %p2109_p12 = scmp.lt.s32.totalorder %s2103_s11, %s2103_s11 }
  0x1c   :  { %p2110_p13 = por %p2109_p12, %p2108_p11 }
  0x1e   :  { %p2111_p0 = pnand %p2110_p13, %p2104_p10 }
  0x20   :  { %2114 = shalt.err (!%p2111_p0)
}
  0x21   :  { %44 = dma.hbm_to_vmem [thread:$0]  %s2866_s2, 128, %s42_s8, [#allocation6]  }
  0x22   :  { %s2123_s13 = scalar_lea.vmem %s55_s10, 2048  ;;  %p2128_p2 = scmp.lt.s32.totalorder %s55_s10, %s55_s10 }
  0x23   :  { %p2124_p1 = scmp.ne.s32.totalorder %s55_s10, %s2123_s13  ;;  %p2129_p3 = scmp.lt.s32.totalorder %s2123_s13, %s2123_s13 }
  0x25   :  { %p2130_p4 = por %p2129_p3, %p2128_p2 }
  0x27   :  { %p2131_p5 = pnand %p2130_p4, %p2124_p1 }
  0x29   :  { %2134 = shalt.err (!%p2131_p5)
}
  0x2a   :  { %s2167_s0 = smov 128   ;;  %s2168_s14 = smov 8  }
  0x2b   :  { %60 = dma.hbm_to_vmem [thread:$0]  %s2869_s5, 2048, %s55_s10, [#allocation9], %s2167_s0, %s2167_s0, %s2168_s14  }
  0x2c   :  { %2155 = dma.done.wait [#allocation3], 128  }
  0x2d   :  { %2156 = vsyncadd [#allocation3], 4294967168 }
  0x2e   :  { %2157 = dma.done.wait [#allocation6], 256  }
  0x2f   :  { %2158 = vsyncadd [#allocation6], 4294967040 }
  0x30   :  { %2159 = dma.done.wait [#allocation9], 2048  }
  0x31   :  { %2160 = vsyncadd [#allocation9], 4294965248  ;;  %v2883_v0 = vmov 0.0   ;;  %vm2170_vm0 = vmmov 0   ;;  %v94_v1 = vld [vmem:[#allocation8 + $0x78] sm:$0xff]  ;;  %v93_v2 = vld [vmem:[#allocation8 + $0x70] sm:$0xff] }
  0x32   :  { %1624 = vmatprep.subr.mxu0 %v2883_v0  ;;  %1659 = vmatprep.subr.mxu1 %v2883_v0  ;;  %v92_v3 = vld [vmem:[#allocation8 + $0x68] sm:$0xff]  ;;  %v2225_v4 = vand.u32 4294901760, %v94_v1  ;;  %v2227_v5 = vand.u32 4294901760, %v93_v2  ;;  %v91_v7 = vld [vmem:[#allocation8 + $0x60] sm:$0xff]  ;;  %v90_v8 = vld [vmem:[#allocation8 + $0x58] sm:$0xff]  ;;  %s2171_s19 = smov [#allocation10]  }
  0x33   :  { %1656 = vmatprep.mubr.msk.f32.mxu0 %vm2170_vm0, %v2883_v0  ;;  %1691 = vmatprep.mubr.msk.f32.mxu1 %vm2170_vm0, %v2883_v0  ;;  %v2229_v6 = vand.u32 4294901760, %v92_v3  ;;  %v89_v9 = vld [vmem:[#allocation8 + $0x50] sm:$0xff]  ;;  %v2231_v10 = vand.u32 4294901760, %v91_v7  ;;  %v2233_v11 = vand.u32 4294901760, %v90_v8  ;;  %v88_v13 = vld [vmem:[#allocation8 + $0x48] sm:$0xff]  ;;  %v87_v14 = vld [vmem:[#allocation8 + $0x40] sm:$0xff] }
  0x34   :  { %v2235_v12 = vand.u32 4294901760, %v89_v9  ;;  %1625 = vmatpush3.msra.mxu0 %v2225_v4  ;;  %v2239_v15 = vsub.f32 %v94_v1, %v2225_v4  ;;  %v2242_v16 = vsub.f32 %v93_v2, %v2227_v5  ;;  %v2244_v17 = vand.u32 4294901760, %v88_v13  ;;  %v86_v19 = vld [vmem:[#allocation8 + $0x38] sm:$0xff]  ;;  %v85_v26 = vld [vmem:[#allocation8 + $0x30] sm:$0xff]  ;;  %v84_v36 = vld [vmem:[#allocation8 + $0x28] sm:$0xff]  ;;  %s1407_s20 = sshll.u32 %s2171_s19, 4  ;;  %s1408_s20 = int_to_ptr.vmem [resolvable:$true] %s1407_s20 }
  0x35   :  { %v2247_v18 = vsub.f32 %v92_v3, %v2229_v6  ;;  %1626 = vmatprep.subr.mxu0 %v2883_v0  ;;  %v2251_v20 = vsub.f32 %v91_v7, %v2231_v10  ;;  %v2254_v21 = vsub.f32 %v90_v8, %v2233_v11  ;;  %v2266_v25 = vand.u32 4294901760, %v87_v14  ;;  %v83_v41 = vld [vmem:[#allocation8 + $0x20] sm:$0xff]  ;;  %v73_v48 = vld [vmem:[#allocation2] sm:$0xff]  ;;  %v74_v49 = vld [vmem:[#allocation5] sm:$0xff]  ;;  %s2135_s21 = scalar_lea.vmem %s1408_s20, 128  ;;  %p2140_p7 = scmp.lt.s32.totalorder %s1408_s20, %s1408_s20 }
  0x36   :  { %1627 = vmatpush3.msra.mxu0 %v2227_v5  ;;  %v2258_v22 = vand.u32 4294901760, %v2239_v15  ;;  %v2261_v23 = vand.u32 4294901760, %v2242_v16  ;;  %v2272_v28 = vand.u32 4294901760, %v86_v19  ;;  %v2278_v30 = vsub.f32 %v89_v9, %v2235_v12  ;;  %v82_v51 = vld [vmem:[#allocation8 + $0x18] sm:$0xff]  ;;  %v81_v55 = vld [vmem:[#allocation8 + $0x10] sm:$0xff]  ;;  %v80_v62 = vld [vmem:[#allocation8 + $0x8] sm:$0xff]  ;;  %p2136_p6 = scmp.ne.s32.totalorder %s1408_s20, %s2135_s21  ;;  %p2141_p8 = scmp.lt.s32.totalorder %s2135_s21, %s2135_s21 }
  0x37   :  { %v2264_v24 = vand.u32 4294901760, %v2247_v18  ;;  %1628 = vmatprep.subr.mxu0 %v2883_v0  ;;  %v2270_v27 = vand.u32 4294901760, %v2251_v20  ;;  %v2275_v29 = vand.u32 4294901760, %v2254_v21  ;;  %v2288_v34 = vsub.f32 %v88_v13, %v2244_v17  ;;  %v77_v1 = vld [vmem:[#allocation7] sm:$0xff]  ;;  %v79_v13 = vld [vmem:[#allocation8] sm:$0xff] }
  0x38   :  { %1629 = vmatpush3.msra.mxu0 %v2229_v6  ;;  %v190_v31 = vsub.f32 %v2239_v15, %v2258_v22  ;;  %v197_v32 = vsub.f32 %v2242_v16, %v2261_v23  ;;  %v2291_v35 = vand.u32 4294901760, %v85_v26  ;;  %v2301_v40 = vand.u32 4294901760, %v2278_v30  ;;  %p2142_p9 = por %p2141_p8, %p2140_p7 }
  0x39   :  { %v204_v33 = vsub.f32 %v2247_v18, %v2264_v24  ;;  %1630 = vmatprep.subr.mxu0 %v2883_v0  ;;  %v211_v39 = vsub.f32 %v2251_v20, %v2270_v27  ;;  %v218_v42 = vsub.f32 %v2254_v21, %v2275_v29  ;;  %v2307_v43 = vsub.f32 %v87_v14, %v2266_v25 }
  0x3a   :  { %1631 = vmatpush3.msra.mxu0 %v2231_v10  ;;  %v2294_v37 = vand.u32 4294901760, %v190_v31  ;;  %v2296_v38 = vand.u32 4294901760, %v197_v32  ;;  %v2313_v45 = vand.u32 4294901760, %v84_v36  ;;  %v2316_v46 = vand.u32 4294901760, %v2288_v34  ;;  %p2143_p10 = pnand %p2142_p9, %p2136_p6 }
  0x3b   :  { %1632 = vmatprep.subr.mxu0 %v2883_v0  ;;  %v2311_v44 = vand.u32 4294901760, %v204_v33  ;;  %v2319_v47 = vsub.f32 %v86_v19, %v2272_v28  ;;  %v2323_v50 = vand.u32 4294901760, %v83_v41  ;;  %v2327_v52 = vand.u32 4294901760, %v211_v39 }
  0x3c   :  { %1633 = vmatpush3.msra.mxu0 %v2233_v11  ;;  %1660 = vmatpush3.msra.mxu1 %v2294_v37  ;;  %v225_v53 = vsub.f32 %v2278_v30, %v2301_v40  ;;  %v2332_v54 = vand.u32 4294901760, %v2307_v43  ;;  %v2335_v56 = vsub.f32 %v85_v26, %v2291_v35  ;;  %v2339_v57 = vand.u32 4294901760, %v218_v42 }
  0x3d   :  { %1634 = vmatprep.subr.mxu0 %v2883_v0  ;;  %1661 = vmatprep.subr.mxu1 %v2883_v0  ;;  %2885 = vst [vmem:[#allocation15_spill] sm:$0xff] %v2327_v52  ;;  %v75_v58 = vadd.f32 %v74_v49, %v73_v48  ;;  %v232_v59 = vsub.f32 %v2288_v34, %v2316_v46  ;;  %v2345_v60 = vand.u32 4294901760, %v82_v51  ;;  %v2348_v61 = vand.u32 4294901760, %v2319_v47 }
  0x3e   :  { %1635 = vmatpush3.msra.mxu0 %v2235_v12  ;;  %1662 = vmatpush3.msra.mxu1 %v2296_v38  ;;  %2886 = vst [vmem:[#allocation16_spill] sm:$0xff] %v2339_v57  ;;  %v2351_v63 = vsub.f32 %v84_v36, %v2313_v45  ;;  %v2355_v2 = vand.u32 4294901760, %v81_v55  ;;  %v2359_v7 = vand.u32 4294901760, %v225_v53  ;;  %v239_v8 = vsub.f32 %v2307_v43, %v2332_v54 }
  0x3f   :  { %1636 = vmatprep.subr.mxu0 %v2883_v0  ;;  %1663 = vmatprep.subr.mxu1 %v2883_v0  ;;  %v76_v3 = vmul.f32 0.5, %v75_v58  ;;  %v2364_v9 = vand.u32 4294901760, %v2335_v56  ;;  %v2367_v14 = vsub.f32 %v83_v41, %v2323_v50  ;;  %v2371_v19 = vand.u32 4294901760, %v80_v62 }
  0x40   :  { %1637 = vmatpush3.msra.mxu0 %v2244_v17  ;;  %1664 = vmatpush3.msra.mxu1 %v2311_v44  ;;  %2887 = vst [vmem:[#allocation17_spill] sm:$0xff] %v2359_v7  ;;  %v2377_v31 = vand.u32 4294901760, %v232_v59  ;;  %v246_v32 = vsub.f32 %v2319_v47, %v2348_v61  ;;  %v2382_v33 = vand.u32 4294901760, %v2351_v63  ;;  %v2385_v36 = vsub.f32 %v82_v51, %v2345_v60 }
  0x41   :  { %1638 = vmatprep.subr.mxu0 %v2883_v0  ;;  %1665 = vmatprep.subr.mxu1 %v2883_v0  ;;  %v2373_v26 = vadd.f32 %v77_v1, %v76_v3  ;;  %v2389_v39 = vand.u32 4294901760, %v79_v13  ;;  %v2396_v42 = vand.u32 4294901760, %v239_v8  ;;  %v253_v48 = vsub.f32 %v2335_v56, %v2364_v9 }
  0x42   :  { %1639 = vmatpush3.msra.mxu0 %v2266_v25  ;;  %1666 = vmatpush3.msra.mxu1 %v2327_v52  ;;  %2889 = vst [vmem:[#allocation19_spill] sm:$0xff] %v2377_v31  ;;  %v2401_v49 = vand.u32 4294901760, %v2367_v14  ;;  %v2404_v51 = vsub.f32 %v81_v55, %v2355_v2  ;;  %v2414_v58 = vand.u32 4294901760, %v246_v32  ;;  %v260_v59 = vsub.f32 %v2351_v63, %v2382_v33 }
  0x43   :  { %1640 = vmatprep.subr.mxu0 %v2883_v0  ;;  %1667 = vmatprep.subr.mxu1 %v2883_v0  ;;  %2888 = vst [vmem:[#allocation18_spill] sm:$0xff] %v2373_v26  ;;  %v2392_v41 = vand.u32 4294901760, %v2373_v26  ;;  %2890 = vst [vmem:[#allocation20_spill] sm:$0xff] %v2396_v42  ;;  %v2419_v55 = vand.u32 4294901760, %v2385_v36  ;;  %v2422_v1 = vsub.f32 %v80_v62, %v2371_v19  ;;  %v2429_v8 = vand.u32 4294901760, %v253_v48 }
  0x44   :  { %1641 = vmatpush3.msra.mxu0 %v2272_v28  ;;  %1668 = vmatpush3.msra.mxu1 %v2339_v57  ;;  %2891 = vst [vmem:[#allocation21_spill] sm:$0xff] %v2414_v58  ;;  %v267_v32 = vsub.f32 %v2367_v14, %v2401_v49  ;;  %v2437_v62 = vsub.f32 %v79_v13, %v2389_v39  ;;  %v2443_v3 = vand.u32 4294901760, %v260_v59 }
  0x45   :  { %1642 = vmatprep.subr.mxu0 %v2883_v0  ;;  %1669 = vmatprep.subr.mxu1 %v2883_v0  ;;  %v2410_v53 = vsub.f32 %v2373_v26, %v2392_v41  ;;  %2892 = vst [vmem:[#allocation22_spill] sm:$0xff] %v2419_v55  ;;  %2893 = vst [vmem:[#allocation23_spill] sm:$0xff] %v2429_v8  ;;  %v2434_v26 = vand.u32 4294901760, %v2404_v51  ;;  %v2451_v13 = vand.u32 4294901760, %v2422_v1 }
  0x46   :  { %1643 = vmatpush3.msra.mxu0 %v2291_v35  ;;  %1670 = vmatpush3.msra.mxu1 %v2359_v7  ;;  %v2457_v59 = vand.u32 4294901760, %v267_v32 }
  0x47   :  { %1644 = vmatprep.subr.mxu0 %v2883_v0  ;;  %1671 = vmatprep.subr.mxu1 %v2883_v0  ;;  %2894 = vst [vmem:[#allocation24_spill] sm:$0xff] %v2434_v26  ;;  %v2895_v48 = vand.u32 4294901760, %v2410_v53  ;;  %2896 = vst [vmem:[#allocation25_spill] sm:$0xff] %v2451_v13  ;;  %v288_v32 = vsub.f32 %v2422_v1, %v2451_v13 }
  0x48   :  { %1645 = vmatpush3.msra.mxu0 %v2313_v45  ;;  %1672 = vmatpush3.msra.mxu1 %v2377_v31  ;;  %v274_v31 = vsub.f32 %v2385_v36, %v2419_v55 }
  0x49   :  { %1646 = vmatprep.subr.mxu0 %v2883_v0  ;;  %1673 = vmatprep.subr.mxu1 %v2883_v0 }
  0x4a   :  { %1647 = vmatpush3.msra.mxu0 %v2323_v50  ;;  %1674 = vmatpush3.msra.mxu1 %v2396_v42  ;;  %v179_v42 = vsub.f32 %v2410_v53, %v2895_v48  ;;  %v2462_v48 = vand.u32 4294901760, %v2437_v62  ;;  %v2468_v57 = vand.u32 4294901760, %v274_v31  ;;  %v2483_v31 = vand.u32 4294901760, %v288_v32 }
  0x4b   :  { %1648 = vmatprep.subr.mxu0 %v2883_v0  ;;  %1675 = vmatprep.subr.mxu1 %v2883_v0 }
  0x4c   :  { %1649 = vmatpush3.msra.mxu0 %v2345_v60  ;;  %1676 = vmatpush3.msra.mxu1 %v2414_v58  ;;  %v281_v58 = vsub.f32 %v2404_v51, %v2434_v26  ;;  %2897 = vst [vmem:[#allocation26_spill] sm:$0xff] %v2462_v48  ;;  %v180_v7 = vand.u32 4294901760, %v179_v42  ;;  %v295_v52 = vsub.f32 %v2437_v62, %v2462_v48 }
  0x4d   :  { %1650 = vmatprep.subr.mxu0 %v2883_v0  ;;  %1677 = vmatprep.subr.mxu1 %v2883_v0 }
  0x4e   :  { %1651 = vmatpush3.msra.mxu0 %v2355_v2  ;;  %1678 = vmatpush3.msra.mxu1 %v2429_v8  ;;  %v2476_v8 = vand.u32 4294901760, %v281_v58  ;;  %v2489_v42 = vand.u32 4294901760, %v295_v52  ;;  %v2898_v52 = vand.u32 4294901760, %v2410_v53  ;;  %v2905_v58 = vld [vmem:[#allocation23_spill] sm:$0xff] }
  0x4f   :  { %1652 = vmatprep.subr.mxu0 %v2883_v0  ;;  %1679 = vmatprep.subr.mxu1 %v2883_v0 }
  0x50   :  { %1653 = vmatpush3.msra.mxu0 %v2371_v19  ;;  %1680 = vmatpush3.msra.mxu1 %v2443_v3 }
  0x51   :  { %1654 = vmatprep.subr.mxu0 %v2883_v0  ;;  %1681 = vmatprep.subr.mxu1 %v2883_v0 }
  0x52   :  { %1655 = vmatpush3.msra.mxu0 %v2389_v39  ;;  %1682 = vmatpush3.msra.mxu1 %v2457_v59 }
  0x53   :  { %1683 = vmatprep.subr.mxu1 %v2883_v0  ;;  %1694 = vmatprep.subr.mxu0 %v2883_v0 }
  0x54   :  { %1657 = vmatmul.mubr.f32.vlgmr.msra.gmra.mxu0 %v180_v7  ;;  %1684 = vmatpush3.msra.mxu1 %v2468_v57  ;;  %v2902_v7 = vld [vmem:[#allocation19_spill] sm:$0xff] }
  0x55   :  { %1695 = vmatpush3.msra.mxu0 %v2239_v15  ;;  %1685 = vmatprep.subr.mxu1 %v2883_v0 }
  0x56   :  { %1696 = vmatprep.subr.mxu0 %v2883_v0  ;;  %1686 = vmatpush3.msra.mxu1 %v2476_v8 }
  0x57   :  { %1697 = vmatpush3.msra.mxu0 %v2242_v16  ;;  %1687 = vmatprep.subr.mxu1 %v2883_v0 }
  0x58   :  { %1698 = vmatprep.subr.mxu0 %v2883_v0  ;;  %1688 = vmatpush3.msra.mxu1 %v2483_v31 }
  0x59   :  { %1699 = vmatpush3.msra.mxu0 %v2247_v18  ;;  %1689 = vmatprep.subr.mxu1 %v2883_v0 }
  0x5a   :  { %1700 = vmatprep.subr.mxu0 %v2883_v0  ;;  %1690 = vmatpush3.msra.mxu1 %v2489_v42 }
  0x5b   :  { %1701 = vmatpush3.msra.mxu0 %v2251_v20  ;;  %1692 = vmatmul.mubr.f32.vlgmr.msra.gmra.mxu1 %v2392_v41 }
  0x5c   :  { %1702 = vmatprep.subr.mxu0 %v2883_v0  ;;  %1729 = vmatprep.subr.mxu1 %v2883_v0 }
  0x5d   :  { %1703 = vmatpush3.msra.mxu0 %v2254_v21  ;;  %1730 = vmatpush3.msra.mxu1 %v2225_v4 }
  0x5e   :  { %1704 = vmatprep.subr.mxu0 %v2883_v0  ;;  %1731 = vmatprep.subr.mxu1 %v2883_v0 }
  0x5f   :  { %1705 = vmatpush3.msra.mxu0 %v2278_v30  ;;  %1732 = vmatpush3.msra.mxu1 %v2227_v5 }
  0x60   :  { %1706 = vmatprep.subr.mxu0 %v2883_v0  ;;  %1733 = vmatprep.subr.mxu1 %v2883_v0 }
  0x61   :  { %1707 = vmatpush3.msra.mxu0 %v2288_v34  ;;  %1734 = vmatpush3.msra.mxu1 %v2229_v6 }
  0x62   :  { %1708 = vmatprep.subr.mxu0 %v2883_v0  ;;  %1735 = vmatprep.subr.mxu1 %v2883_v0 }
  0x63   :  { %1709 = vmatpush3.msra.mxu0 %v2307_v43  ;;  %1736 = vmatpush3.msra.mxu1 %v2231_v10 }
  0x64   :  { %1710 = vmatprep.subr.mxu0 %v2883_v0  ;;  %1737 = vmatprep.subr.mxu1 %v2883_v0 }
  0x65   :  { %1711 = vmatpush3.msra.mxu0 %v2319_v47  ;;  %1738 = vmatpush3.msra.mxu1 %v2233_v11 }
  0x66   :  { %1712 = vmatprep.subr.mxu0 %v2883_v0  ;;  %1739 = vmatprep.subr.mxu1 %v2883_v0 }
  0x67   :  { %1713 = vmatpush3.msra.mxu0 %v2335_v56  ;;  %1740 = vmatpush3.msra.mxu1 %v2235_v12 }
  0x68   :  { %1714 = vmatprep.subr.mxu0 %v2883_v0  ;;  %1741 = vmatprep.subr.mxu1 %v2883_v0 }
  0x69   :  { %1715 = vmatpush3.msra.mxu0 %v2351_v63  ;;  %1742 = vmatpush3.msra.mxu1 %v2244_v17 }
  0x6a   :  { %1716 = vmatprep.subr.mxu0 %v2883_v0  ;;  %1743 = vmatprep.subr.mxu1 %v2883_v0 }
  0x6b   :  { %1717 = vmatpush3.msra.mxu0 %v2367_v14  ;;  %1744 = vmatpush3.msra.mxu1 %v2266_v25 }
  0x6c   :  { %1718 = vmatprep.subr.mxu0 %v2883_v0  ;;  %1745 = vmatprep.subr.mxu1 %v2883_v0 }
  0x6d   :  { %1719 = vmatpush3.msra.mxu0 %v2385_v36  ;;  %1746 = vmatpush3.msra.mxu1 %v2272_v28 }
  0x6e   :  { %1720 = vmatprep.subr.mxu0 %v2883_v0  ;;  %1747 = vmatprep.subr.mxu1 %v2883_v0 }
  0x6f   :  { %1721 = vmatpush3.msra.mxu0 %v2404_v51  ;;  %1748 = vmatpush3.msra.mxu1 %v2291_v35 }
  0x70   :  { %1722 = vmatprep.subr.mxu0 %v2883_v0  ;;  %1749 = vmatprep.subr.mxu1 %v2883_v0 }
  0x71   :  { %1723 = vmatpush3.msra.mxu0 %v2422_v1  ;;  %1750 = vmatpush3.msra.mxu1 %v2313_v45 }
  0x72   :  { %1724 = vmatprep.subr.mxu0 %v2883_v0  ;;  %1751 = vmatprep.subr.mxu1 %v2883_v0 }
  0x73   :  { %1725 = vmatpush3.msra.mxu0 %v2437_v62  ;;  %1726 = vmatprep.mubr.msk.f32.mxu0 %vm2170_vm0, %v2883_v0 }
  0x74   :  { %1752 = vmatpush3.msra.mxu1 %v2323_v50  ;;  %1727 = vmatmul.mubr.f32.vlgmr.msra.gmra.mxu0 %v2410_v53  ;;  %v2904_v53 = vld [vmem:[#allocation21_spill] sm:$0xff] }
  0x75   :  { %1753 = vmatprep.subr.mxu1 %v2883_v0  ;;  %1764 = vmatprep.subr.mxu0 %v2883_v0 }
  0x76   :  { %1754 = vmatpush3.msra.mxu1 %v2345_v60  ;;  %1765 = vmatpush3.msra.mxu0 %v2258_v22 }
  0x77   :  { %1755 = vmatprep.subr.mxu1 %v2883_v0  ;;  %1766 = vmatprep.subr.mxu0 %v2883_v0 }
  0x78   :  { %1756 = vmatpush3.msra.mxu1 %v2355_v2  ;;  %1767 = vmatpush3.msra.mxu0 %v2261_v23 }
  0x79   :  { %1757 = vmatprep.subr.mxu1 %v2883_v0  ;;  %1768 = vmatprep.subr.mxu0 %v2883_v0 }
  0x7a   :  { %1758 = vmatpush3.msra.mxu1 %v2371_v19  ;;  %1769 = vmatpush3.msra.mxu0 %v2264_v24 }
  0x7b   :  { %1759 = vmatprep.subr.mxu1 %v2883_v0  ;;  %1770 = vmatprep.subr.mxu0 %v2883_v0 }
  0x7c   :  { %1760 = vmatpush3.msra.mxu1 %v2389_v39  ;;  %1761 = vmatprep.mubr.msk.f32.mxu1 %vm2170_vm0, %v2883_v0 }
  0x7d   :  { %1771 = vmatpush3.msra.mxu0 %v2270_v27  ;;  %1762 = vmatmul.mubr.f32.vlgmr.msra.gmra.mxu1 %v2898_v52 }
  0x7e   :  { %1772 = vmatprep.subr.mxu0 %v2883_v0  ;;  %1799 = vmatprep.subr.mxu1 %v2883_v0 }
  0x7f   :  { %1773 = vmatpush3.msra.mxu0 %v2275_v29  ;;  %1800 = vmatpush3.msra.mxu1 %v2225_v4 }
  0x80   :  { %1774 = vmatprep.subr.mxu0 %v2883_v0  ;;  %1801 = vmatprep.subr.mxu1 %v2883_v0 }
  0x81   :  { %1775 = vmatpush3.msra.mxu0 %v2301_v40  ;;  %1802 = vmatpush3.msra.mxu1 %v2227_v5 }
  0x82   :  { %1776 = vmatprep.subr.mxu0 %v2883_v0  ;;  %1803 = vmatprep.subr.mxu1 %v2883_v0 }
  0x83   :  { %1777 = vmatpush3.msra.mxu0 %v2316_v46  ;;  %1804 = vmatpush3.msra.mxu1 %v2229_v6 }
  0x84   :  { %1778 = vmatprep.subr.mxu0 %v2883_v0  ;;  %1805 = vmatprep.subr.mxu1 %v2883_v0 }
  0x85   :  { %1779 = vmatpush3.msra.mxu0 %v2332_v54  ;;  %1806 = vmatpush3.msra.mxu1 %v2231_v10 }
  0x86   :  { %1780 = vmatprep.subr.mxu0 %v2883_v0  ;;  %1807 = vmatprep.subr.mxu1 %v2883_v0 }
  0x87   :  { %1781 = vmatpush3.msra.mxu0 %v2348_v61  ;;  %1808 = vmatpush3.msra.mxu1 %v2233_v11 }
  0x88   :  { %1782 = vmatprep.subr.mxu0 %v2883_v0  ;;  %1809 = vmatprep.subr.mxu1 %v2883_v0 }
  0x89   :  { %1783 = vmatpush3.msra.mxu0 %v2364_v9  ;;  %1810 = vmatpush3.msra.mxu1 %v2235_v12 }
  0x8a   :  { %1784 = vmatprep.subr.mxu0 %v2883_v0  ;;  %1811 = vmatprep.subr.mxu1 %v2883_v0 }
  0x8b   :  { %1785 = vmatpush3.msra.mxu0 %v2382_v33  ;;  %1812 = vmatpush3.msra.mxu1 %v2244_v17 }
  0x8c   :  { %1786 = vmatprep.subr.mxu0 %v2883_v0  ;;  %1813 = vmatprep.subr.mxu1 %v2883_v0 }
  0x8d   :  { %1787 = vmatpush3.msra.mxu0 %v2401_v49  ;;  %1814 = vmatpush3.msra.mxu1 %v2266_v25 }
  0x8e   :  { %1788 = vmatprep.subr.mxu0 %v2883_v0  ;;  %1815 = vmatprep.subr.mxu1 %v2883_v0 }
  0x8f   :  { %1789 = vmatpush3.msra.mxu0 %v2419_v55  ;;  %1816 = vmatpush3.msra.mxu1 %v2272_v28  ;;  %v2906_v55 = vld [vmem:[#allocation18_spill] sm:$0xff] }
  0x90   :  { %1790 = vmatprep.subr.mxu0 %v2883_v0  ;;  %1817 = vmatprep.subr.mxu1 %v2883_v0 }
  0x91   :  { %1791 = vmatpush3.msra.mxu0 %v2434_v26  ;;  %1818 = vmatpush3.msra.mxu1 %v2291_v35 }
  0x92   :  { %1792 = vmatprep.subr.mxu0 %v2883_v0  ;;  %1819 = vmatprep.subr.mxu1 %v2883_v0 }
  0x93   :  { %1793 = vmatpush3.msra.mxu0 %v2451_v13  ;;  %1820 = vmatpush3.msra.mxu1 %v2313_v45 }
  0x94   :  { %1794 = vmatprep.subr.mxu0 %v2883_v0  ;;  %1821 = vmatprep.subr.mxu1 %v2883_v0 }
  0x95   :  { %1795 = vmatpush3.msra.mxu0 %v2462_v48  ;;  %1796 = vmatprep.mubr.msk.f32.mxu0 %vm2170_vm0, %v2883_v0 }
  0x96   :  { %1822 = vmatpush3.msra.mxu1 %v2323_v50  ;;  %1797 = vmatmul.mubr.f32.vlgmr.msra.gmra.mxu0 %v2392_v41 }
  0x97   :  { %1823 = vmatprep.subr.mxu1 %v2883_v0  ;;  %1831 = vmatprep.mubr.msk.f32.mxu1 %vm2170_vm0, %v2883_v0 }
  0x98   :  { %1824 = vmatpush3.msra.mxu1 %v2345_v60  ;;  %1834 = vmatprep.subr.mxu0 %v2883_v0 }
  0x99   :  { %1825 = vmatprep.subr.mxu1 %v2883_v0  ;;  %1835 = vmatpush3.msra.mxu0 %v2225_v4 }
  0x9a   :  { %1826 = vmatpush3.msra.mxu1 %v2355_v2  ;;  %1836 = vmatprep.subr.mxu0 %v2883_v0 }
  0x9b   :  { %1827 = vmatprep.subr.mxu1 %v2883_v0  ;;  %1837 = vmatpush3.msra.mxu0 %v2227_v5 }
  0x9c   :  { %1828 = vmatpush3.msra.mxu1 %v2371_v19  ;;  %1838 = vmatprep.subr.mxu0 %v2883_v0 }
  0x9d   :  { %1829 = vmatprep.subr.mxu1 %v2883_v0  ;;  %1839 = vmatpush3.msra.mxu0 %v2229_v6 }
  0x9e   :  { %1830 = vmatpush3.msra.mxu1 %v2389_v39  ;;  %1840 = vmatprep.subr.mxu0 %v2883_v0 }
  0x9f   :  { %1832 = vmatmul.mubr.f32.vlgmr.msra.gmra.mxu1 %v2392_v41  ;;  %1869 = vmatprep.subr.mxu1 %v2883_v0  ;;  %v2903_v41 = vld [vmem:[#allocation20_spill] sm:$0xff] }
  0xa0   :  { %1870 = vmatpush3.msra.mxu1 %v2294_v37  ;;  %1841 = vmatpush3.msra.mxu0 %v2231_v10  ;;  %v2899_v37 = vld [vmem:[#allocation15_spill] sm:$0xff] }
  0xa1   :  { %1871 = vmatprep.subr.mxu1 %v2883_v0  ;;  %1842 = vmatprep.subr.mxu0 %v2883_v0 }
  0xa2   :  { %1872 = vmatpush3.msra.mxu1 %v2296_v38  ;;  %1843 = vmatpush3.msra.mxu0 %v2233_v11  ;;  %v2900_v38 = vld [vmem:[#allocation16_spill] sm:$0xff] }
  0xa3   :  { %1873 = vmatprep.subr.mxu1 %v2883_v0  ;;  %1844 = vmatprep.subr.mxu0 %v2883_v0 }
  0xa4   :  { %1874 = vmatpush3.msra.mxu1 %v2311_v44  ;;  %1845 = vmatpush3.msra.mxu0 %v2235_v12  ;;  %v2901_v44 = vld [vmem:[#allocation17_spill] sm:$0xff] }
  0xa5   :  { %1875 = vmatprep.subr.mxu1 %v2883_v0  ;;  %1846 = vmatprep.subr.mxu0 %v2883_v0 }
  0xa6   :  { %1876 = vmatpush3.msra.mxu1 %v2899_v37  ;;  %1847 = vmatpush3.msra.mxu0 %v2244_v17 }
  0xa7   :  { %1877 = vmatprep.subr.mxu1 %v2883_v0  ;;  %1848 = vmatprep.subr.mxu0 %v2883_v0 }
  0xa8   :  { %1878 = vmatpush3.msra.mxu1 %v2900_v38  ;;  %1849 = vmatpush3.msra.mxu0 %v2266_v25 }
  0xa9   :  { %1879 = vmatprep.subr.mxu1 %v2883_v0  ;;  %1850 = vmatprep.subr.mxu0 %v2883_v0 }
  0xaa   :  { %1880 = vmatpush3.msra.mxu1 %v2901_v44  ;;  %1851 = vmatpush3.msra.mxu0 %v2272_v28 }
  0xab   :  { %1881 = vmatprep.subr.mxu1 %v2883_v0  ;;  %1852 = vmatprep.subr.mxu0 %v2883_v0 }
  0xac   :  { %1882 = vmatpush3.msra.mxu1 %v2902_v7  ;;  %1853 = vmatpush3.msra.mxu0 %v2291_v35 }
  0xad   :  { %1883 = vmatprep.subr.mxu1 %v2883_v0  ;;  %1854 = vmatprep.subr.mxu0 %v2883_v0 }
  0xae   :  { %1884 = vmatpush3.msra.mxu1 %v2903_v41  ;;  %1855 = vmatpush3.msra.mxu0 %v2313_v45 }
  0xaf   :  { %1885 = vmatprep.subr.mxu1 %v2883_v0  ;;  %1856 = vmatprep.subr.mxu0 %v2883_v0 }
  0xb0   :  { %1886 = vmatpush3.msra.mxu1 %v2904_v53  ;;  %1857 = vmatpush3.msra.mxu0 %v2323_v50 }
  0xb1   :  { %1887 = vmatprep.subr.mxu1 %v2883_v0  ;;  %1858 = vmatprep.subr.mxu0 %v2883_v0 }
  0xb2   :  { %1888 = vmatpush3.msra.mxu1 %v2905_v58  ;;  %1901 = vmatprep.mubr.msk.f32.mxu1 %vm2170_vm0, %v2883_v0 }
  0xb3   :  { %1889 = vmatprep.subr.mxu1 %v2883_v0  ;;  %1859 = vmatpush3.msra.mxu0 %v2345_v60 }
  0xb4   :  { %1890 = vmatpush3.msra.mxu1 %v2443_v3  ;;  %1860 = vmatprep.subr.mxu0 %v2883_v0 }
  0xb5   :  { %1891 = vmatprep.subr.mxu1 %v2883_v0  ;;  %1861 = vmatpush3.msra.mxu0 %v2355_v2 }
  0xb6   :  { %1892 = vmatpush3.msra.mxu1 %v2457_v59  ;;  %1862 = vmatprep.subr.mxu0 %v2883_v0 }
  0xb7   :  { %1893 = vmatprep.subr.mxu1 %v2883_v0  ;;  %1863 = vmatpush3.msra.mxu0 %v2371_v19 }
  0xb8   :  { %1894 = vmatpush3.msra.mxu1 %v2468_v57  ;;  %1864 = vmatprep.subr.mxu0 %v2883_v0 }
  0xb9   :  { %1895 = vmatprep.subr.mxu1 %v2883_v0  ;;  %1865 = vmatpush3.msra.mxu0 %v2389_v39 }
  0xba   :  { %1896 = vmatpush3.msra.mxu1 %v2476_v8  ;;  %1866 = vmatprep.mubr.msk.f32.mxu0 %vm2170_vm0, %v2883_v0 }
  0xbb   :  { %1897 = vmatprep.subr.mxu1 %v2883_v0  ;;  %1904 = vmatprep.subr.mxu0 %v2883_v0 }
  0xbc   :  { %1898 = vmatpush3.msra.mxu1 %v2483_v31 }
  0xbd   :  { %1899 = vmatprep.subr.mxu1 %v2883_v0 }
  0xbe   :  { %1900 = vmatpush3.msra.mxu1 %v2489_v42 }
  0xbf   :  { %1939 = vmatprep.subr.mxu1 %v2883_v0 }
 0x114   :  { %v182_v57 = vpop.f32.mrf.mxu0 }
 0x116   :  { %v1658_v3 = vpop.f32.mrf.mxu0 }
 0x11b   :  { %v333_v59 = vpop.f32.mrf.mxu1 }
 0x11c   :  { %v334_v7 = vadd.f32 %v333_v59, %v182_v57  ;;  %v2907_v57 = vmov 0.0  }
 0x11d   :  { %v1693_v32 = vpop.f32.mrf.mxu1 }
 0x134   :  { %v437_v8 = vpop.f32.mrf.mxu0 }
 0x135   :  { %v438_v53 = vadd.f32 %v437_v8, %v334_v7 }
 0x136   :  { %v1728_v52 = vpop.f32.mrf.mxu0 }
 0x13d   :  { %v526_v37 = vpop.f32.mrf.mxu1 }
 0x13e   :  { %v527_v58 = vadd.f32 %v526_v37, %v438_v53 }
 0x13f   :  { %v1763_v38 = vpop.f32.mrf.mxu1 }
 0x156   :  { %v645_v44 = vpop.f32.mrf.mxu0 }
 0x157   :  { %v646_v31 = vadd.f32 %v645_v44, %v527_v58 }
 0x158   :  { %v1798_v41 = vpop.f32.mrf.mxu0 }
 0x15f   :  { %v732_v48 = vpop.f32.mrf.mxu1 }
 0x160   :  { %v733_v13 = vadd.f32 %v732_v48, %v646_v31 }
 0x161   :  { %v1833_v26 = vpop.f32.mrf.mxu1 }
 0x162   :  { %v736_v42 = vmul.f32 0.03125, %v733_v13 }
 0x164   :  { %v2705_v0 = vsub.f32 %v2906_v55, %v736_v42 }
 0x166   :  { %v738_v3 = vmul.f32 %v2705_v0, %v2705_v0 }
 0x168   :  { %v2709_v32 = vand.u32 4294901760, %v738_v3 }
 0x16a   :  { %v2712_v52 = vsub.f32 %v738_v3, %v2709_v32  ;;  %1902 = vmatmul.mubr.f32.vlgmr.msra.gmra.mxu1 %v2709_v32 }
 0x16b   :  { %1940 = vmatpush3.msra.mxu1 %v2225_v4  ;;  %1971 = vmatprep.mubr.msk.f32.mxu1 %vm2170_vm0, %v2907_v57 }
 0x16c   :  { %1941 = vmatprep.subr.mxu1 %v2907_v57  ;;  %v822_v26 = vand.u32 4294901760, %v2712_v52 }
 0x16d   :  { %1942 = vmatpush3.msra.mxu1 %v2227_v5 }
 0x16e   :  { %1943 = vmatprep.subr.mxu1 %v2907_v57  ;;  %v823_v55 = vsub.f32 %v2712_v52, %v822_v26 }
 0x16f   :  { %1944 = vmatpush3.msra.mxu1 %v2229_v6 }
 0x170   :  { %1945 = vmatprep.subr.mxu1 %v2907_v57  ;;  %v824_v13 = vand.u32 4294901760, %v823_v55 }
 0x171   :  { %1946 = vmatpush3.msra.mxu1 %v2231_v10 }
 0x172   :  { %1947 = vmatprep.subr.mxu1 %v2907_v57  ;;  %1867 = vmatmul.mubr.f32.vlgmr.msra.gmra.mxu0 %v824_v13 }
 0x173   :  { %1905 = vmatpush3.msra.mxu0 %v2239_v15  ;;  %1948 = vmatpush3.msra.mxu1 %v2233_v11 }
 0x174   :  { %1906 = vmatprep.subr.mxu0 %v2907_v57  ;;  %1949 = vmatprep.subr.mxu1 %v2907_v57 }
 0x175   :  { %1907 = vmatpush3.msra.mxu0 %v2242_v16  ;;  %1950 = vmatpush3.msra.mxu1 %v2235_v12 }
 0x176   :  { %1908 = vmatprep.subr.mxu0 %v2907_v57  ;;  %1951 = vmatprep.subr.mxu1 %v2907_v57 }
 0x177   :  { %1909 = vmatpush3.msra.mxu0 %v2247_v18  ;;  %1952 = vmatpush3.msra.mxu1 %v2244_v17 }
 0x178   :  { %1910 = vmatprep.subr.mxu0 %v2907_v57  ;;  %1953 = vmatprep.subr.mxu1 %v2907_v57 }
 0x179   :  { %1911 = vmatpush3.msra.mxu0 %v2251_v20  ;;  %1954 = vmatpush3.msra.mxu1 %v2266_v25 }
 0x17a   :  { %1912 = vmatprep.subr.mxu0 %v2907_v57  ;;  %1955 = vmatprep.subr.mxu1 %v2907_v57 }
 0x17b   :  { %1913 = vmatpush3.msra.mxu0 %v2254_v21  ;;  %1956 = vmatpush3.msra.mxu1 %v2272_v28 }
 0x17c   :  { %1914 = vmatprep.subr.mxu0 %v2907_v57  ;;  %1957 = vmatprep.subr.mxu1 %v2907_v57 }
 0x17d   :  { %1915 = vmatpush3.msra.mxu0 %v2278_v30  ;;  %1958 = vmatpush3.msra.mxu1 %v2291_v35 }
 0x17e   :  { %1916 = vmatprep.subr.mxu0 %v2907_v57  ;;  %1959 = vmatprep.subr.mxu1 %v2907_v57 }
 0x17f   :  { %1917 = vmatpush3.msra.mxu0 %v2288_v34  ;;  %1960 = vmatpush3.msra.mxu1 %v2313_v45 }
 0x180   :  { %1918 = vmatprep.subr.mxu0 %v2907_v57  ;;  %1961 = vmatprep.subr.mxu1 %v2907_v57 }
 0x181   :  { %1919 = vmatpush3.msra.mxu0 %v2307_v43  ;;  %1962 = vmatpush3.msra.mxu1 %v2323_v50 }
 0x182   :  { %1920 = vmatprep.subr.mxu0 %v2907_v57  ;;  %1963 = vmatprep.subr.mxu1 %v2907_v57 }
 0x183   :  { %1921 = vmatpush3.msra.mxu0 %v2319_v47  ;;  %1964 = vmatpush3.msra.mxu1 %v2345_v60  ;;  %v1419_v47 = vld [vmem:[%s2868_s4] ss:$0 sm:$0xff] }
 0x184   :  { %1922 = vmatprep.subr.mxu0 %v2907_v57  ;;  %1965 = vmatprep.subr.mxu1 %v2907_v57 }
 0x185   :  { %1923 = vmatpush3.msra.mxu0 %v2335_v56  ;;  %1966 = vmatpush3.msra.mxu1 %v2355_v2 }
 0x186   :  { %1924 = vmatprep.subr.mxu0 %v2907_v57  ;;  %1967 = vmatprep.subr.mxu1 %v2907_v57 }
 0x187   :  { %1925 = vmatpush3.msra.mxu0 %v2351_v63  ;;  %1968 = vmatpush3.msra.mxu1 %v2371_v19 }
 0x188   :  { %1926 = vmatprep.subr.mxu0 %v2907_v57  ;;  %1969 = vmatprep.subr.mxu1 %v2907_v57 }
 0x189   :  { %1927 = vmatpush3.msra.mxu0 %v2367_v14  ;;  %1970 = vmatpush3.msra.mxu1 %v2389_v39 }
 0x18a   :  { %1928 = vmatprep.subr.mxu0 %v2907_v57  ;;  %1972 = vmatmul.mubr.f32.vlgmr.msra.gmra.mxu1 %v822_v26 }
 0x18b   :  { %2009 = vmatprep.subr.mxu1 %v2907_v57  ;;  %1929 = vmatpush3.msra.mxu0 %v2385_v36 }
 0x18c   :  { %2010 = vmatpush3.msra.mxu1 %v2225_v4  ;;  %1930 = vmatprep.subr.mxu0 %v2907_v57  ;;  %v2908_v4 = vld [vmem:[#allocation22_spill] sm:$0xff] }
 0x18d   :  { %2011 = vmatprep.subr.mxu1 %v2907_v57  ;;  %1931 = vmatpush3.msra.mxu0 %v2404_v51 }
 0x18e   :  { %2012 = vmatpush3.msra.mxu1 %v2227_v5  ;;  %1932 = vmatprep.subr.mxu0 %v2907_v57  ;;  %v2909_v5 = vld [vmem:[#allocation24_spill] sm:$0xff] }
 0x18f   :  { %2013 = vmatprep.subr.mxu1 %v2907_v57  ;;  %1933 = vmatpush3.msra.mxu0 %v2422_v1 }
 0x190   :  { %2014 = vmatpush3.msra.mxu1 %v2229_v6  ;;  %1934 = vmatprep.subr.mxu0 %v2907_v57  ;;  %v2910_v6 = vld [vmem:[#allocation25_spill] sm:$0xff] }
 0x191   :  { %2015 = vmatprep.subr.mxu1 %v2907_v57  ;;  %1935 = vmatpush3.msra.mxu0 %v2437_v62 }
 0x192   :  { %1936 = vmatprep.mubr.msk.f32.mxu0 %vm2170_vm0, %v2907_v57  ;;  %2016 = vmatpush3.msra.mxu1 %v2231_v10  ;;  %v2911_v10 = vld [vmem:[#allocation26_spill] sm:$0xff] }
 0x193   :  { %1937 = vmatmul.mubr.f32.vlgmr.msra.gmra.mxu0 %v2712_v52  ;;  %1974 = vmatprep.subr.mxu0 %v2907_v57 }
 0x194   :  { %2017 = vmatprep.subr.mxu1 %v2907_v57  ;;  %1975 = vmatpush3.msra.mxu0 %v2258_v22 }
 0x195   :  { %2018 = vmatpush3.msra.mxu1 %v2233_v11  ;;  %1976 = vmatprep.subr.mxu0 %v2907_v57 }
 0x196   :  { %2019 = vmatprep.subr.mxu1 %v2907_v57  ;;  %1977 = vmatpush3.msra.mxu0 %v2261_v23 }
 0x197   :  { %2020 = vmatpush3.msra.mxu1 %v2235_v12  ;;  %1978 = vmatprep.subr.mxu0 %v2907_v57 }
 0x198   :  { %2021 = vmatprep.subr.mxu1 %v2907_v57  ;;  %1979 = vmatpush3.msra.mxu0 %v2264_v24 }
 0x199   :  { %2022 = vmatpush3.msra.mxu1 %v2244_v17  ;;  %1980 = vmatprep.subr.mxu0 %v2907_v57 }
 0x19a   :  { %2023 = vmatprep.subr.mxu1 %v2907_v57  ;;  %1981 = vmatpush3.msra.mxu0 %v2270_v27 }
 0x19b   :  { %2024 = vmatpush3.msra.mxu1 %v2266_v25  ;;  %1982 = vmatprep.subr.mxu0 %v2907_v57 }
 0x19c   :  { %2025 = vmatprep.subr.mxu1 %v2907_v57  ;;  %1983 = vmatpush3.msra.mxu0 %v2275_v29 }
 0x19d   :  { %2026 = vmatpush3.msra.mxu1 %v2272_v28  ;;  %1984 = vmatprep.subr.mxu0 %v2907_v57 }
 0x19e   :  { %2027 = vmatprep.subr.mxu1 %v2907_v57  ;;  %1985 = vmatpush3.msra.mxu0 %v2301_v40 }
 0x19f   :  { %2028 = vmatpush3.msra.mxu1 %v2291_v35  ;;  %1986 = vmatprep.subr.mxu0 %v2907_v57 }
 0x1a0   :  { %2029 = vmatprep.subr.mxu1 %v2907_v57  ;;  %1987 = vmatpush3.msra.mxu0 %v2316_v46 }
 0x1a1   :  { %2030 = vmatpush3.msra.mxu1 %v2313_v45  ;;  %1988 = vmatprep.subr.mxu0 %v2907_v57  ;;  %v1418_v45 = vld [vmem:[%s2867_s3] ss:$0 sm:$0xff] }
 0x1a2   :  { %2031 = vmatprep.subr.mxu1 %v2907_v57  ;;  %1989 = vmatpush3.msra.mxu0 %v2332_v54 }
 0x1a3   :  { %2032 = vmatpush3.msra.mxu1 %v2323_v50  ;;  %1990 = vmatprep.subr.mxu0 %v2907_v57 }
 0x1a4   :  { %2033 = vmatprep.subr.mxu1 %v2907_v57  ;;  %1991 = vmatpush3.msra.mxu0 %v2348_v61 }
 0x1a5   :  { %2034 = vmatpush3.msra.mxu1 %v2345_v60  ;;  %1992 = vmatprep.subr.mxu0 %v2907_v57 }
 0x1a6   :  { %2035 = vmatprep.subr.mxu1 %v2907_v57  ;;  %1993 = vmatpush3.msra.mxu0 %v2364_v9 }
 0x1a7   :  { %2036 = vmatpush3.msra.mxu1 %v2355_v2  ;;  %1994 = vmatprep.subr.mxu0 %v2907_v57 }
 0x1a8   :  { %2037 = vmatprep.subr.mxu1 %v2907_v57  ;;  %1995 = vmatpush3.msra.mxu0 %v2382_v33 }
 0x1a9   :  { %2038 = vmatpush3.msra.mxu1 %v2371_v19  ;;  %1996 = vmatprep.subr.mxu0 %v2907_v57 }
 0x1aa   :  { %2039 = vmatprep.subr.mxu1 %v2907_v57  ;;  %1997 = vmatpush3.msra.mxu0 %v2401_v49 }
 0x1ab   :  { %2040 = vmatpush3.msra.mxu1 %v2389_v39  ;;  %2041 = vmatprep.mubr.msk.f32.mxu1 %vm2170_vm0, %v2907_v57 }
 0x1ac   :  { %1998 = vmatprep.subr.mxu0 %v2907_v57  ;;  %2042 = vmatmul.mubr.f32.vlgmr.msra.gmra.mxu1 %v2709_v32 }
 0x1ad   :  { %1999 = vmatpush3.msra.mxu0 %v2908_v4  ;;  %2006 = vmatprep.mubr.msk.f32.mxu0 %vm2170_vm0, %v2907_v57 }
 0x1ae   :  { %2000 = vmatprep.subr.mxu0 %v2907_v57 }
 0x1af   :  { %2001 = vmatpush3.msra.mxu0 %v2909_v5 }
 0x1b0   :  { %2002 = vmatprep.subr.mxu0 %v2907_v57 }
 0x1b1   :  { %2003 = vmatpush3.msra.mxu0 %v2910_v6 }
 0x1b2   :  { %2004 = vmatprep.subr.mxu0 %v2907_v57 }
 0x1b3   :  { %2005 = vmatpush3.msra.mxu0 %v2911_v10 }
 0x1b4   :  { %2007 = vmatmul.mubr.f32.vlgmr.msra.gmra.mxu0 %v2709_v32 }
 0x22a   :  { %v977_v11 = vpop.f32.mrf.mxu1 }
 0x22c   :  { %v1903_v12 = vpop.f32.mrf.mxu1 }
 0x232   :  { %v826_v15 = vpop.f32.mrf.mxu0 }
 0x233   :  { %v978_v23 = vadd.f32 %v977_v11, %v826_v15 }
 0x234   :  { %v1868_v16 = vpop.f32.mrf.mxu0 }
 0x24a   :  { %v1170_v17 = vpop.f32.mrf.mxu1 }
 0x24c   :  { %v1973_v18 = vpop.f32.mrf.mxu1 }
 0x253   :  { %v1081_v20 = vpop.f32.mrf.mxu0 }
 0x254   :  { %v1082_v25 = vadd.f32 %v1081_v20, %v978_v23 }
 0x255   :  { %v1938_v21 = vpop.f32.mrf.mxu0 }
 0x256   :  { %v1171_v27 = vadd.f32 %v1170_v17, %v1082_v25 }
 0x26c   :  { %v1376_v22 = vpop.f32.mrf.mxu1 }
 0x26e   :  { %v2043_v24 = vpop.f32.mrf.mxu1 }
 0x274   :  { %v1289_v28 = vpop.f32.mrf.mxu0 }
 0x275   :  { %v1290_v29 = vadd.f32 %v1289_v28, %v1171_v27 }
 0x276   :  { %v2008_v30 = vpop.f32.mrf.mxu0 }
 0x277   :  { %v1377_v34 = vadd.f32 %v1376_v22, %v1290_v29 }
 0x279   :  { %v1380_v35 = vmul.f32 0.03125, %v1377_v34 }
 0x27b   :  { %v1381_v40 = vadd.f32 1e-05, %v1380_v35 }
 0x27d   :  { %2053 = vrsqrt.f32 %v1381_v40 }
 0x28a   :  { %v2054_v43 = vpop.eup %2053 }
 0x28b   :  { %v1383_v46 = vmul.f32 %v2054_v43, %v2705_v0 }
 0x28d   :  { %v1391_v50 = vmul.f32 %v1418_v45, %v1383_v46 }
 0x28f   :  { %v1399_v54 = vadd.f32 %v1419_v47, %v1391_v50 }
 0x291   :  { %1400 = vst [vmem:[#allocation10] sm:$0xff] %v1399_v54 }
 0x292   :  { %2146 = shalt.err (!%p2143_p10)
}
 0x293   :  { %1410 = dma.vmem_to_hbm [thread:$0]  %s1408_s20, 128, %s2870_s6, [#allocation4]  }
 0x294   :  { %2161 = dma.done.wait [#allocation4], 128  }
 0x295   :  { %2162 = vsyncadd [#allocation4], 4294967168 }
 0x296   :  { %1414 = vsyncpa [#allocation3], 1 }
 0x297   :  { %1415 = vsyncpa [#allocation6], 1 }
 0x298   :  { %1416 = vsyncpa [#allocation9], 1 }
 0x299   :  { %1417 = vsyncpa [#allocation4], 1 }

</bundles_post_ra>
